<compile_context>
chip_gen: v5e
topology: v5e:2x2
jax: 0.10.0
libtpu: 0.0.40
codegen_flags: <defaults>
</compile_context>

<pallas_src>
import functools

import jax
import jax.numpy as jnp
from jax.experimental import pallas as pl
from jax.experimental.pallas import tpu as pltpu


# ---------------------------------------------------------------------------
# Regime A: HW-tiled streaming reduction (grid = (B, n_hw))
# ---------------------------------------------------------------------------
def _ca_kernel_hw_tiled(x_ref, w1_ref, w2_ref, o_ref, sum_ref, max_ref,
                        *, hw_total, tile_hw, ragged):
    # x_ref:   (1, C, TILE_HW) native-dtype tile for the current batch item
    # w1_ref:  (C, Ch)   fc1 weight (transposed 1x1-conv weight), resident
    # w2_ref:  (Ch, C)   fc2 weight (transposed 1x1-conv weight), resident
    # o_ref:   (1, 1, C) sigmoid attention for this batch item
    # sum_ref / max_ref: (1, C) f32 accumulators, resident across HW tiles
    k = pl.program_id(1)
    nk = pl.num_programs(1)

    @pl.when(k == 0)
    def _init():
        sum_ref[...] = jnp.zeros_like(sum_ref)
        max_ref[...] = jnp.full_like(max_ref, -jnp.inf)

    def _accum_unmasked():
        x = x_ref[...]                                            # native dtype
        sum_ref[...] += jnp.sum(x, axis=-1, dtype=jnp.float32)    # (1, C)
        tile_max = jnp.max(x, axis=-1)                            # (1, C)
        max_ref[...] = jnp.maximum(max_ref[...], tile_max.astype(jnp.float32))

    if ragged:
        # Fast path for interior tiles: pure load + add/max stream.
        @pl.when(k < nk - 1)
        def _interior():
            _accum_unmasked()

        # Masked path only on the final (partial) tile; mask after f32 upcast
        # so the -inf fill is well-defined regardless of the input dtype.
        @pl.when(k == nk - 1)
        def _last():
            x = x_ref[...].astype(jnp.float32)                    # (1, C, T)
            lane = jax.lax.broadcasted_iota(jnp.int32, x.shape, dimension=2)
            valid = (k * tile_hw + lane) < hw_total
            sum_ref[...] += jnp.sum(jnp.where(valid, x, 0.0), axis=-1)
            tile_max = jnp.max(jnp.where(valid, x, -jnp.inf), axis=-1)
            max_ref[...] = jnp.maximum(max_ref[...], tile_max)
    else:
        _accum_unmasked()

    @pl.when(k == nk - 1)
    def _finalize():
        avg = sum_ref[...] * jnp.float32(1.0 / hw_total)          # (1, C)
        mx = max_ref[...]                                         # (1, C)
        pooled = jnp.concatenate([avg, mx], axis=0)               # (2, C)
        w1 = w1_ref[...].astype(jnp.float32)                      # (C, Ch)
        w2 = w2_ref[...].astype(jnp.float32)                      # (Ch, C)
        h = jnp.maximum(
            jnp.dot(pooled, w1, preferred_element_type=jnp.float32), 0.0)
        y = jnp.dot(h, w2, preferred_element_type=jnp.float32)    # (2, C)
        att = jax.nn.sigmoid(y[0:1] + y[1:2])                     # (1, C)
        o_ref[...] = att[None].astype(o_ref.dtype)                # (1, 1, C)


# ---------------------------------------------------------------------------
# Regime B: batch-blocked single pass (grid = (B // TB,))
# ---------------------------------------------------------------------------
def _ca_kernel_batch_blocked(x_ref, w1_ref, w2_ref, o_ref, *, hw_total):
    # x_ref: (TB, C, HW) ; o_ref: (TB, 1, C)
    x = x_ref[...]
    s = jnp.sum(x, axis=-1, dtype=jnp.float32)                    # (TB, C)
    avg = s * jnp.float32(1.0 / hw_total)
    mx = jnp.max(x, axis=-1).astype(jnp.float32)                  # (TB, C)
    pooled = jnp.concatenate([avg, mx], axis=0)                   # (2*TB, C)
    w1 = w1_ref[...].astype(jnp.float32)                          # (C, Ch)
    w2 = w2_ref[...].astype(jnp.float32)                          # (Ch, C)
    h = jnp.maximum(
        jnp.dot(pooled, w1, preferred_element_type=jnp.float32), 0.0)
    y = jnp.dot(h, w2, preferred_element_type=jnp.float32)        # (2*TB, C)
    tb = x.shape[0]
    att = jax.nn.sigmoid(y[:tb] + y[tb:])                         # (TB, C)
    o_ref[...] = att[:, None, :].astype(o_ref.dtype)              # (TB, 1, C)


# ---------------------------------------------------------------------------
# Tile selection helpers
# ---------------------------------------------------------------------------
_DEFAULT_TILE_BUDGET = 8 * 1024 * 1024   # bytes per in-flight input buffer


def _pick_tile_hw(hw, c, itemsize, budget_bytes):
    """Spatial (lane) tile. Returns (tile_hw, ragged).

    Prefers a multiple of 128 that exactly divides HW (no mask anywhere) and
    keeps per-channel contiguous DMA rows >= ~4 KiB (>= ~1024 lanes) where
    possible.  Falls back to the largest 128-multiple within budget (ragged).
    """
    row_bytes = max(1, c * itemsize)
    if hw <= 128 or hw * row_bytes <= budget_bytes:
        return hw, False                       # whole spatial extent fits
    max_lanes = budget_bytes // row_bytes
    if max_lanes < 128:
        # C is very large; fall back to the full extent rather than tiny rows.
        return hw, False
    max_mult = (min(hw, max_lanes) // 128) * 128
    lane_floor = min(1024, max_mult)
    t = max_mult
    while t >= lane_floor:
        if hw % t == 0:
            return t, False                    # exact divisor -> never ragged
        t -= 128
    return max_mult, True                      # ragged last tile (masked)


def _largest_divisor_leq(n, k):
    k = max(1, min(n, k))
    for d in range(k, 0, -1):
        if n % d == 0:
            return d
    return 1


def _vmem_limit_bytes(tile_bytes):
    # 2x (double-buffered input) + weights/out/scratch headroom; keep under
    # ~48 MiB so the same setting is valid on v7x (64 MiB physical VMEM).
    return int(min(48 * 2**20, max(32 * 2**20, 2 * tile_bytes + 8 * 2**20)))


# ---------------------------------------------------------------------------
# Wrapper
# ---------------------------------------------------------------------------
def channel_attention(x_nchw, fc1_w, fc2_w, tile_budget_bytes=None):
    """x_nchw: (B, C, H, W); fc1_w: (Ch, C, 1, 1); fc2_w: (C, Ch, 1, 1).

    Returns (B, C, 1, 1) sigmoid attention weights, matching the PyTorch
    module's forward output.
    """
    B, C, H, W = x_nchw.shape
    Ch = fc1_w.shape[0]
    HW = H * W
    budget = _DEFAULT_TILE_BUDGET if tile_budget_bytes is None else int(tile_budget_bytes)

    x_flat = x_nchw.reshape(B, C, HW)
    # PyTorch conv-weight layout (out, in, 1, 1) -> matmul layout.
    w1 = jnp.transpose(fc1_w.reshape(Ch, C))   # (C, Ch)
    w2 = jnp.transpose(fc2_w.reshape(C, Ch))   # (Ch, C)

    itemsize = jnp.dtype(x_flat.dtype).itemsize
    tile_hw, ragged = _pick_tile_hw(HW, C, itemsize, budget)
    n_hw = pl.cdiv(HW, tile_hw)

    if n_hw == 1:
        # --- Regime B: one HW block per step; amortize step overhead over TB
        # batch rows (small-HW / large-B regime).
        per_batch = C * HW * itemsize
        tb = _largest_divisor_leq(B, budget // max(1, per_batch))
        tile_bytes = tb * per_batch
        kernel = functools.partial(_ca_kernel_batch_blocked, hw_total=HW)
        out = pl.pallas_call(
            kernel,
            out_shape=jax.ShapeDtypeStruct((B, 1, C), x_nchw.dtype),
            grid=(B // tb,),
            in_specs=[
                pl.BlockSpec((tb, C, HW), lambda b: (b, 0, 0)),
                pl.BlockSpec((C, Ch), lambda b: (0, 0)),   # resident weights
                pl.BlockSpec((Ch, C), lambda b: (0, 0)),
            ],
            out_specs=pl.BlockSpec((tb, 1, C), lambda b: (b, 0, 0)),
            compiler_params=pltpu.CompilerParams(
                dimension_semantics=("parallel",),
                vmem_limit_bytes=_vmem_limit_bytes(tile_bytes),
            ),
        )(x_flat, w1, w2)
    else:
        # --- Regime A: streaming HW reduction with resident f32 accumulators.
        tile_bytes = C * tile_hw * itemsize
        kernel = functools.partial(
            _ca_kernel_hw_tiled, hw_total=HW, tile_hw=tile_hw, ragged=ragged)
        out = pl.pallas_call(
            kernel,
            out_shape=jax.ShapeDtypeStruct((B, 1, C), x_nchw.dtype),
            grid=(B, n_hw),
            in_specs=[
                pl.BlockSpec((1, C, tile_hw), lambda b, k: (b, 0, k)),
                pl.BlockSpec((C, Ch), lambda b, k: (0, 0)),   # resident weights
                pl.BlockSpec((Ch, C), lambda b, k: (0, 0)),
            ],
            out_specs=pl.BlockSpec((1, 1, C), lambda b, k: (b, 0, 0)),
            scratch_shapes=[
                pltpu.VMEM((1, C), jnp.float32),   # running sum
                pltpu.VMEM((1, C), jnp.float32),   # running max
            ],
            compiler_params=pltpu.CompilerParams(
                dimension_semantics=("parallel", "arbitrary"),
                vmem_limit_bytes=_vmem_limit_bytes(tile_bytes),
            ),
        )(x_flat, w1, w2)

    return out.reshape(B, C, 1, 1)


# ---------------------------------------------------------------------------
# Pure-JAX reference (mirrors the PyTorch forward)
# ---------------------------------------------------------------------------
def _reference(x_nchw, fc1_w, fc2_w):
    B, C, H, W = x_nchw.shape
    Ch = fc1_w.shape[0]
    w1 = fc1_w.reshape(Ch, C)   # (Ch, C)
    w2 = fc2_w.reshape(C, Ch)   # (C, Ch)
    avg = jnp.mean(x_nchw, axis=(2, 3))   # (B, C)
    mx = jnp.max(x_nchw, axis=(2, 3))     # (B, C)

    def mlp(p):
        return jnp.maximum(p @ w1.T, 0.0) @ w2.T

    out = jax.nn.sigmoid(mlp(avg) + mlp(mx))
    return out.reshape(B, C, 1, 1)


if __name__ == "__main__":
    master = jax.random.PRNGKey(0)

    def run_case(B, C, H, W, ratio, budget, key):
        Ch = max(1, C // ratio)
        kx, k1, k2 = jax.random.split(key, 3)
        x = jax.random.normal(kx, (B, C, H, W), dtype=jnp.float32)
        # Deterministic synthetic weights (PyTorch conv layout: out, in, 1, 1).
        fc1_w = jax.random.normal(k1, (Ch, C, 1, 1), dtype=jnp.float32) * 0.1
        fc2_w = jax.random.normal(k2, (C, Ch, 1, 1), dtype=jnp.float32) * 0.1
        out = channel_attention(x, fc1_w, fc2_w, tile_budget_bytes=budget)
        out = jax.block_until_ready(out)
        ref = _reference(x, fc1_w, fc2_w)
        assert out.shape == (B, C, 1, 1), out.shape
        assert jnp.allclose(out, ref, atol=1e-5, rtol=1e-5), \
            f"mismatch vs reference for case {(B, C, H, W, budget)}"

    keys = jax.random.split(master, 4)
    # Default budget, small HW -> batch-blocked single-pass path (regime B, TB=B).
    run_case(2, 64, 16, 20, 16, None, keys[0])
    # Tiny budget forces HW tiling with a ragged last tile (regime A, masked tail).
    run_case(2, 64, 16, 20, 16, 64 * 1024, keys[1])
    # Exact-divisor HW tiling: multi-tile reduction with no masking (regime A).
    run_case(1, 64, 16, 32, 16, 64 * 1024, keys[2])
    # Batch-blocked multi-step path (regime B with TB < B).
    run_case(4, 32, 8, 16, 16, 32 * 1024, keys[3])

    print("KERNEL_OK")
</pallas_src>

<mosaic_0001>
module attributes {stable_mosaic.version = 11 : i64} {
  func.func @_ca_kernel_batch_blocked(%arg0: i32, %arg1: memref<2x64x320xf32, #tpu.memory_space<vmem>>, %arg2: memref<64x4xf32, #tpu.memory_space<vmem>>, %arg3: memref<4x64xf32, #tpu.memory_space<vmem>>, %arg4: memref<2x1x64xf32, #tpu.memory_space<vmem>>) attributes {dimension_semantics = [#tpu.dimension_semantics<parallel>], iteration_bounds = array<i64: 1>, scalar_prefetch = 0 : i64, scratch_operands = 0 : i64, tpu.core_type = #tpu.core_type<tc>, window_params = [{transform_indices = @transform_0, window_bounds = array<i64: 2, 64, 320>}, {pipeline_mode = #tpu.pipeline_mode<synchronous>, transform_indices = @transform_1, window_bounds = array<i64: 64, 4>}, {pipeline_mode = #tpu.pipeline_mode<synchronous>, transform_indices = @transform_2, window_bounds = array<i64: 4, 64>}, {transform_indices = @transform_3, window_bounds = array<i64: 2, 1, 64>}]} {
    %c0 = arith.constant 0 : index
    %c0_0 = arith.constant 0 : index
    %c0_1 = arith.constant 0 : index
    %0 = vector.load %arg1[%c0, %c0_0, %c0_1] : memref<2x64x320xf32, #tpu.memory_space<vmem>>, vector<2x64x320xf32>
    %cst = arith.constant dense<0.000000e+00> : vector<2x64xf32>
    %1 = vector.multi_reduction <add>, %0, %cst [2] : vector<2x64x320xf32> to vector<2x64xf32>
    %cst_2 = arith.constant 3.125000e-03 : f32
    %2 = vector.broadcast %cst_2 : f32 to vector<2x64xf32>
    %3 = arith.mulf %1, %2 : vector<2x64xf32>
    %cst_3 = arith.constant dense<0xFF800000> : vector<2x64xf32>
    %4 = vector.multi_reduction <maximumf>, %0, %cst_3 [2] : vector<2x64x320xf32> to vector<2x64xf32>
    %5 = tpu.concatenate %3, %4 in 0 : vector<2x64xf32>, vector<2x64xf32> -> vector<4x64xf32>
    %c0_4 = arith.constant 0 : index
    %c0_5 = arith.constant 0 : index
    %6 = vector.load %arg2[%c0_4, %c0_5] : memref<64x4xf32, #tpu.memory_space<vmem>>, vector<64x4xf32>
    %c0_6 = arith.constant 0 : index
    %c0_7 = arith.constant 0 : index
    %7 = vector.load %arg3[%c0_6, %c0_7] : memref<4x64xf32, #tpu.memory_space<vmem>>, vector<4x64xf32>
    %cst_8 = arith.constant dense<0.000000e+00> : vector<4x4xf32>
    %8 = tpu.matmul %5, %6, %cst_8 {dimension_numbers = #tpu.dot_dimension_numbers<[1], [0], [0], [1], [0, 0, 1, 1], [], []>} : vector<4x64xf32>, vector<64x4xf32>, vector<4x4xf32> -> vector<4x4xf32>
    %cst_9 = arith.constant 0.000000e+00 : f32
    %9 = vector.broadcast %cst_9 : f32 to vector<4x4xf32>
    %10 = arith.maximumf %8, %9 : vector<4x4xf32>
    %cst_10 = arith.constant dense<0.000000e+00> : vector<4x64xf32>
    %11 = tpu.matmul %10, %7, %cst_10 {dimension_numbers = #tpu.dot_dimension_numbers<[1], [0], [0], [1], [0, 0, 1, 1], [], []>} : vector<4x4xf32>, vector<4x64xf32>, vector<4x64xf32> -> vector<4x64xf32>
    %12 = vector.extract_strided_slice %11 {offsets = [0, 0], sizes = [2, 64], strides = [1, 1]} : vector<4x64xf32> to vector<2x64xf32>
    %13 = vector.extract_strided_slice %11 {offsets = [2, 0], sizes = [2, 64], strides = [1, 1]} : vector<4x64xf32> to vector<2x64xf32>
    %14 = arith.addf %12, %13 : vector<2x64xf32>
    %15 = arith.negf %14 : vector<2x64xf32>
    %16 = math.exp %15 : vector<2x64xf32>
    %cst_11 = arith.constant 1.000000e+00 : f32
    %17 = vector.broadcast %cst_11 : f32 to vector<2x64xf32>
    %18 = arith.addf %17, %16 : vector<2x64xf32>
    %19 = arith.divf %17, %18 : vector<2x64xf32>
    %20 = vector.shape_cast %19 : vector<2x64xf32> to vector<2x1x64xf32>
    %c0_12 = arith.constant 0 : index
    %c0_13 = arith.constant 0 : index
    %c0_14 = arith.constant 0 : index
    %21 = vector.load %arg4[%c0_12, %c0_13, %c0_14] : memref<2x1x64xf32, #tpu.memory_space<vmem>>, vector<2x1x64xf32>
    tpu.vector_store %arg4[%c0_12, %c0_13, %c0_14], %20 {strides = array<i32>} : memref<2x1x64xf32, #tpu.memory_space<vmem>>, vector<2x1x64xf32>,
    return
  }
  func.func @transform_0(%arg0: i32) -> (i32, i32, i32) {
    %c0_i32 = arith.constant 0 : i32
    %c0_i32_0 = arith.constant 0 : i32
    %c0_i32_1 = arith.constant 0 : i32
    return %arg0, %c0_i32, %c0_i32_0 : i32, i32, i32
  }
  func.func @transform_1(%arg0: i32) -> (i32, i32) {
    %c0_i32 = arith.constant 0 : i32
    %c0_i32_0 = arith.constant 0 : i32
    %c0_i32_1 = arith.constant 0 : i32
    return %c0_i32, %c0_i32_0 : i32, i32
  }
  func.func @transform_2(%arg0: i32) -> (i32, i32) {
    %c0_i32 = arith.constant 0 : i32
    %c0_i32_0 = arith.constant 0 : i32
    %c0_i32_1 = arith.constant 0 : i32
    return %c0_i32, %c0_i32_0 : i32, i32
  }
  func.func @transform_3(%arg0: i32) -> (i32, i32, i32) {
    %c0_i32 = arith.constant 0 : i32
    %c0_i32_0 = arith.constant 0 : i32
    %c0_i32_1 = arith.constant 0 : i32
    return %arg0, %c0_i32, %c0_i32_0 : i32, i32, i32
  }
}

</mosaic_0001>

<bundles_post_ra>
// kernel: tpu_custom_call.1
= control target key start
LH: loop header
LB: loop body
LE: loop exit
PB: predicated region body
PF: predicated region fallthrough
CT: control target
= control target key end

     0   :  { %8 = vsyncpa [#allocation3], 0  ;;  %s839_s0 = inlined_call_operand.hbm [shape: f32[2,64,320], index: 0, kind: input, shape index: {}]   ;;  %s840_s1 = inlined_call_operand.vmem [shape: f32[64,4], index: 1, kind: input, shape index: {}]   ;;  %s841_s2 = inlined_call_operand.vmem [shape: f32[4,64], index: 2, kind: input, shape index: {}]   ;;  %s842_s3 = inlined_call_operand.hbm [shape: f32[2,1,64], index: 3, kind: output, shape index: {}]  }
   0x1   :  { %9 = vsyncpa [#allocation4], 0  ;;  %s14_s14 = sshll.u32 %s839_s0, 4  ;;  %s547_s15 = smov [#allocation2]   ;;  %s15_s14 = int_to_ptr.hbm [resolvable:$true] %s14_s14 }
   0x2   :  { %s16_s16 = sshll.u32 %s547_s15, 4  ;;  %s548_s17 = smov 384   ;;  %s17_s16 = int_to_ptr.vmem [resolvable:$true] %s16_s16 }
   0x3   :  { %s549_s18 = smov 24  }
   0x4   :  { %22 = dma.hbm_to_vmem [thread:$0]  %s15_s14, 6144, %s17_s16, [#allocation3], %s548_s17, %s548_s17, %s549_s18  }
   0x5   :  { %543 = dma.done.wait [#allocation3], 6144  }
   0x6   :  { %544 = vsyncadd [#allocation3], 4294961152  ;;  %vm80_vm0 = vcmask 523264   ;;  %v576_v0 = vld [vmem:[#allocation2 + $0xc0] sm:$0xff]  ;;  %v578_v1 = vld [vmem:[#allocation2 + $0xc8] sm:$0xff]  ;;  %vm277_vm1 = vcmask 130112  }
   0x7   :  { %v57_v2 = vld [vmem:[#allocation2 + $0xd0] sm:$0xff]  ;;  %v120_v3 = vadd.f32 %v578_v1, %v576_v0  ;;  %v585_v6 = vld [vmem:[#allocation2 + $0x38] sm:$0xff]  ;;  %v587_v7 = vld [vmem:[#allocation2 + $0x40] sm:$0xff]  ;;  %v216_v51 = vmax.f32 %v576_v0, %v578_v1  ;;  %vm281_vm2 = vcmask 195712   ;;  %vm285_vm3 = vcmask 261312   ;;  %s468_s11 = sshll.u32 %s842_s3, 4  ;;  %s469_s11 = int_to_ptr.hbm [resolvable:$true] %s468_s11 }
   0x8   :  { %v121_v4 = vsel %vm80_vm0, %v57_v2, 0.0  ;;  %v583_v5 = vld [vmem:[#allocation2 + $0x30] sm:$0xff]  ;;  %v91_v9 = vsel %vm80_vm0, %v587_v7, 0.0  ;;  %v31_v10 = vld [vmem:[#allocation2] sm:$0xff]  ;;  %v32_v11 = vld [vmem:[#allocation2 + $0x8] sm:$0xff]  ;;  %v217_v52 = vsel %vm80_vm0, %v57_v2, -inf }
   0x9   :  { %v90_v8 = vadd.f32 %v585_v6, %v583_v5  ;;  %v33_v12 = vld [vmem:[#allocation2 + $0x10] sm:$0xff]  ;;  %v122_v13 = vadd.f32 %v121_v4, %v120_v3  ;;  %v79_v14 = vadd.f32 %v32_v11, %v31_v10  ;;  %v58_v16 = vld [vmem:[#allocation2 + $0xd8] sm:$0xff]  ;;  %v59_v17 = vld [vmem:[#allocation2 + $0xe0] sm:$0xff]  ;;  %v176_v44 = vmax.f32 %v31_v10, %v32_v11  ;;  %s551_s12 = smov 16   ;;  %s552_s13 = smov 1  }
   0xa   :  { %v81_v15 = vsel %vm80_vm0, %v33_v12, 0.0  ;;  %v60_v18 = vld [vmem:[#allocation2 + $0xe8] sm:$0xff]  ;;  %v594_v20 = vld [vmem:[#allocation2 + $0xf0] sm:$0xff]  ;;  %v596_v21 = vld [vmem:[#allocation2 + $0xf8] sm:$0xff]  ;;  %v125_v24 = vadd.f32 %v59_v17, %v58_v16  ;;  %v177_v45 = vsel %vm80_vm0, %v33_v12, -inf  ;;  %v221_v53 = vmax.f32 %v58_v16, %v59_v17 }
   0xb   :  { %v92_v19 = vadd.f32 %v91_v9, %v90_v8  ;;  %v598_v22 = vld [vmem:[#allocation2 + $0x100] sm:$0xff]  ;;  %123 = vadd.xlane.f32.xlu1 %v122_v13  ;;  %v82_v23 = vadd.f32 %v81_v15, %v79_v14  ;;  %v34_v25 = vld [vmem:[#allocation2 + $0x18] sm:$0xff]  ;;  %v36_v27 = vld [vmem:[#allocation2 + $0x28] sm:$0xff]  ;;  %v126_v28 = vsel %vm80_vm0, %v60_v18, 0.0  ;;  %v130_v29 = vadd.f32 %v596_v21, %v594_v20 }
   0xc   :  { %v35_v26 = vld [vmem:[#allocation2 + $0x20] sm:$0xff]  ;;  %v131_v30 = vsel %vm80_vm0, %v598_v22, 0.0  ;;  %v86_v32 = vsel %vm80_vm0, %v36_v27, 0.0  ;;  %v127_v33 = vadd.f32 %v126_v28, %v125_v24  ;;  %v606_v35 = vld [vmem:[#allocation2 + $0x108] sm:$0xff]  ;;  %v608_v36 = vld [vmem:[#allocation2 + $0x110] sm:$0xff]  ;;  %v178_v49 = vmax.f32 %v176_v44, %v177_v45 }
   0xd   :  { %93 = vadd.xlane.f32.xlu2 %v92_v19  ;;  %83 = vadd.xlane.f32.xlu0 %v82_v23  ;;  %v85_v31 = vadd.f32 %v35_v26, %v34_v25  ;;  %v132_v34 = vadd.f32 %v131_v30, %v130_v29  ;;  %v610_v38 = vld [vmem:[#allocation2 + $0x118] sm:$0xff]  ;;  %v612_v39 = vld [vmem:[#allocation2 + $0x48] sm:$0xff]  ;;  %v614_v40 = vld [vmem:[#allocation2 + $0x50] sm:$0xff]  ;;  %v135_v41 = vadd.f32 %v608_v36, %v606_v35  ;;  %v222_v54 = vsel %vm80_vm0, %v60_v18, -inf }
   0xe   :  { %v618_v42 = vld [vmem:[#allocation2 + $0x58] sm:$0xff]  ;;  %v136_v43 = vsel %vm80_vm0, %v610_v38, 0.0  ;;  %v95_v46 = vadd.f32 %v614_v40, %v612_v39  ;;  %v181_v55 = vmax.f32 %v34_v25, %v35_v26  ;;  %v182_v56 = vsel %vm80_vm0, %v36_v27, -inf  ;;  %v632_v59 = vld [vmem:[#allocation2 + $0x120] sm:$0xff]  ;;  %v634_v60 = vld [vmem:[#allocation2 + $0x128] sm:$0xff] }
   0xf   :  { %v87_v37 = vadd.f32 %v86_v32, %v85_v31  ;;  %v96_v47 = vsel %vm80_vm0, %v618_v42, 0.0  ;;  %v137_v48 = vadd.f32 %v136_v43, %v135_v41  ;;  %v218_v57 = vmax.f32 %v216_v51, %v217_v52  ;;  %v69_v62 = vld [vmem:[#allocation2 + $0x130] sm:$0xff]  ;;  %v43_v63 = vld [vmem:[#allocation2 + $0x60] sm:$0xff]  ;;  %v44_v0 = vld [vmem:[#allocation2 + $0x68] sm:$0xff] }
  0x10   :  { %v97_v50 = vadd.f32 %v96_v47, %v95_v46  ;;  %v223_v58 = vmax.f32 %v221_v53, %v222_v54  ;;  %v183_v61 = vmax.f32 %v181_v55, %v182_v56  ;;  %v140_v1 = vadd.f32 %v634_v60, %v632_v59  ;;  %v45_v2 = vld [vmem:[#allocation2 + $0x70] sm:$0xff]  ;;  %v644_v13 = vld [vmem:[#allocation2 + $0x78] sm:$0xff]  ;;  %v646_v14 = vld [vmem:[#allocation2 + $0x80] sm:$0xff] }
  0x11   :  { %v141_v3 = vsel %vm80_vm0, %v69_v62, 0.0  ;;  %v186_v4 = vmax.f32 %v583_v5, %v585_v6  ;;  %v187_v8 = vsel %vm80_vm0, %v587_v7, -inf  ;;  %v100_v9 = vadd.f32 %v44_v0, %v43_v63  ;;  %v48_v16 = vld [vmem:[#allocation2 + $0x88] sm:$0xff]  ;;  %v648_v17 = vld [vmem:[#allocation2 + $0x138] sm:$0xff]  ;;  %v650_v18 = vld [vmem:[#allocation2 + $0x140] sm:$0xff] }
  0x12   :  { %v101_v10 = vsel %vm80_vm0, %v45_v2, 0.0  ;;  %v142_v11 = vadd.f32 %v141_v3, %v140_v1  ;;  %v652_v5 = vld [vmem:[#allocation2 + $0x148] sm:$0xff]  ;;  %v105_v6 = vadd.f32 %v646_v14, %v644_v13  ;;  %v106_v7 = vsel %vm80_vm0, %v48_v16, 0.0  ;;  %v49_v29 = vld [vmem:[#allocation2 + $0x90] sm:$0xff]  ;;  %v50_v30 = vld [vmem:[#allocation2 + $0x98] sm:$0xff] }
  0x13   :  { %128 = vadd.xlane.f32.xlu1 %v127_v33  ;;  %v188_v12 = vmax.f32 %v186_v4, %v187_v8  ;;  %v102_v15 = vadd.f32 %v101_v10, %v100_v9  ;;  %v145_v19 = vadd.f32 %v650_v18, %v648_v17  ;;  %v146_v23 = vsel %vm80_vm0, %v652_v5, 0.0  ;;  %v51_v31 = vld [vmem:[#allocation2 + $0xa0] sm:$0xff]  ;;  %v73_v44 = vld [vmem:[#allocation2 + $0x150] sm:$0xff]  ;;  %v74_v45 = vld [vmem:[#allocation2 + $0x158] sm:$0xff] }
  0x14   :  { %v226_v24 = vmax.f32 %v594_v20, %v596_v21  ;;  %v227_v25 = vsel %vm80_vm0, %v598_v22, -inf  ;;  %v107_v26 = vadd.f32 %v106_v7, %v105_v6  ;;  %v231_v32 = vmax.f32 %v606_v35, %v608_v36  ;;  %v75_v36 = vld [vmem:[#allocation2 + $0x160] sm:$0xff]  ;;  %v78_v52 = vld [vmem:[#allocation2 + $0x178] sm:$0xff]  ;;  %v52_v53 = vld [vmem:[#allocation2 + $0xa8] sm:$0xff] }
  0x15   :  { %133 = vadd.xlane.f32.xlu2 %v132_v34  ;;  %88 = vadd.xlane.f32.xlu0 %v87_v37  ;;  %v147_v27 = vadd.f32 %v146_v23, %v145_v19  ;;  %v232_v33 = vsel %vm80_vm0, %v610_v38, -inf  ;;  %v110_v34 = vadd.f32 %v50_v30, %v49_v29  ;;  %v111_v20 = vsel %vm80_vm0, %v51_v31, 0.0  ;;  %v53_v54 = vld [vmem:[#allocation2 + $0xb0] sm:$0xff]  ;;  %v54_v56 = vld [vmem:[#allocation2 + $0xb8] sm:$0xff] }
  0x16   :  { %v228_v28 = vmax.f32 %v226_v24, %v227_v25  ;;  %v191_v21 = vmax.f32 %v612_v39, %v614_v40  ;;  %v192_v22 = vsel %vm80_vm0, %v618_v42, -inf  ;;  %v233_v37 = vmax.f32 %v231_v32, %v232_v33 }
  0x17   :  { %v112_v41 = vadd.f32 %v111_v20, %v110_v34  ;;  %v196_v35 = vmax.f32 %v43_v63, %v44_v0  ;;  %v197_v38 = vsel %vm80_vm0, %v45_v2, -inf  ;;  %v236_v46 = vmax.f32 %v632_v59, %v634_v60 }
  0x18   :  { %v193_v43 = vmax.f32 %v191_v21, %v192_v22  ;;  %v237_v39 = vsel %vm80_vm0, %v69_v62, -inf  ;;  %v150_v40 = vadd.f32 %v74_v45, %v73_v44  ;;  %v151_v42 = vsel %vm80_vm0, %v75_v36, 0.0 }
  0x19   :  { %v198_v47 = vmax.f32 %v196_v35, %v197_v38  ;;  %v202_v59 = vsel %vm80_vm0, %v48_v16, -inf  ;;  %v115_v60 = vadd.f32 %v53_v54, %v52_v53  ;;  %v206_v1 = vmax.f32 %v49_v29, %v50_v30 }
  0x1a   :  { %v152_v51 = vadd.f32 %v151_v42, %v150_v40  ;;  %v207_v2 = vsel %vm80_vm0, %v51_v31, -inf  ;;  %v246_v3 = vmax.f32 %v73_v44, %v74_v45  ;;  %v241_v4 = vmax.f32 %v648_v17, %v650_v18 }
  0x1b   :  { %138 = vadd.xlane.f32.xlu1 %v137_v48  ;;  %v238_v48 = vmax.f32 %v236_v46, %v237_v39  ;;  %v247_v8 = vsel %vm80_vm0, %v75_v36, -inf  ;;  %v242_v9 = vsel %vm80_vm0, %v652_v5, -inf  ;;  %v208_v10 = vmax.f32 %v206_v1, %v207_v2 }
  0x1c   :  { %v212_v16 = vsel %vm80_vm0, %v54_v56, -inf  ;;  %v272_v18 = vlaneseq  ;;  %vm289_vm4 = vcmask 326912   ;;  %vm293_vm5 = vcmask 392512  }
  0x1d   :  { %179 = vmax.xlane.f32.xlu2 %v178_v49  ;;  %98 = vadd.xlane.f32.xlu0 %v97_v50  ;;  %v76_v49 = vld [vmem:[#allocation2 + $0x168] sm:$0xff]  ;;  %v77_v50 = vld [vmem:[#allocation2 + $0x170] sm:$0xff]  ;;  %vm297_vm6 = vcmask 458112   ;;  %vm301_vm7 = vcmask 523712   ;;  %vm318_vm8 = vcmask 1041409   ;;  %vm367_vm9 = vcmask 1043459  }
  0x1e   :  { %v155_v55 = vadd.f32 %v77_v50, %v76_v49  ;;  %v692_v23 = vand.u32 127, %v272_v18  ;;  %vm370_vm10 = vcmask 1041408   ;;  %vm409_vm11 = vcmask 1043456  }
  0x1f   :  { %vm405_vm12 = vcmask 31744  }
  0x20   :  { %v695_v25 = vadd.s32 4294967288, %v692_v23  ;;  %v698_v30 = vadd.s32 4294967280, %v692_v23 }
  0x23   :  { %219 = vmax.xlane.f32.xlu1 %v218_v57  ;;  %v156_v57 = vsel %vm80_vm0, %v78_v52, 0.0 }
  0x24   :  { %v157_v62 = vadd.f32 %v156_v57, %v155_v55  ;;  %v375_v55 = vld [vmem:[%s840_s1 + $0x18] sm:$0xff] }
  0x25   :  { %224 = vmax.xlane.f32.xlu2 %v223_v58  ;;  %184 = vmax.xlane.f32.xlu0 %v183_v61  ;;  %v201_v58 = vmax.f32 %v644_v13, %v646_v14  ;;  %v116_v61 = vsel %vm80_vm0, %v54_v56, 0.0  ;;  %v251_v13 = vmax.f32 %v76_v49, %v77_v50  ;;  %v252_v14 = vsel %vm80_vm0, %v78_v52, -inf  ;;  %v378_v52 = vld [vmem:[%s840_s1 + $0x30] sm:$0xff] }
  0x26   :  { %v117_v0 = vadd.f32 %v116_v61, %v115_v60  ;;  %v373_v60 = vld [vmem:[%s840_s1 + $0x8] sm:$0xff]  ;;  %v372_v61 = vld [vmem:[%s840_s1] sm:$0xff] }
  0x27   :  { %v203_v63 = vmax.f32 %v201_v58, %v202_v59  ;;  %v253_v6 = vmax.f32 %v251_v13, %v252_v14  ;;  %v374_v59 = vld [vmem:[%s840_s1 + $0x10] sm:$0xff] }
  0x2b   :  { %143 = vadd.xlane.f32.xlu1 %v142_v11  ;;  %v248_v11 = vmax.f32 %v246_v3, %v247_v8  ;;  %v758_v3 = vadd.s32 4294967264, %v692_v23 }
  0x2d   :  { %189 = vmax.xlane.f32.xlu2 %v188_v12  ;;  %103 = vadd.xlane.f32.xlu0 %v102_v15  ;;  %v243_v12 = vmax.f32 %v241_v4, %v242_v9  ;;  %v211_v15 = vmax.f32 %v52_v53, %v53_v54  ;;  %v377_v53 = vld [vmem:[%s840_s1 + $0x28] sm:$0xff]  ;;  %v376_v54 = vld [vmem:[%s840_s1 + $0x20] sm:$0xff] }
  0x2f   :  { %v213_v7 = vmax.f32 %v211_v15, %v212_v16 }
  0x33   :  { %108 = vadd.xlane.f32.xlu1 %v107_v26 }
  0x35   :  { %148 = vadd.xlane.f32.xlu2 %v147_v27  ;;  %229 = vmax.xlane.f32.xlu0 %v228_v28 }
  0x3b   :  { %234 = vmax.xlane.f32.xlu1 %v233_v37 }
  0x3d   :  { %113 = vadd.xlane.f32.xlu2 %v112_v41  ;;  %194 = vmax.xlane.f32.xlu0 %v193_v43 }
  0x43   :  { %199 = vmax.xlane.f32.xlu1 %v198_v47 }
  0x45   :  { %239 = vmax.xlane.f32.xlu2 %v238_v48  ;;  %153 = vadd.xlane.f32.xlu0 %v152_v51  ;;  %v379_v48 = vld [vmem:[%s840_s1 + $0x38] sm:$0xff] }
  0x46   :  { %392 = vmatpush.msra.mxu0 %v379_v48 }
  0x48   :  { %393 = vmatpush.msra.mxu0 %v378_v52 }
  0x4a   :  { %394 = vmatpush.msra.mxu0 %v377_v53 }
  0x4b   :  { %158 = vadd.xlane.f32.xlu1 %v157_v62 }
  0x4c   :  { %395 = vmatpush.msra.mxu0 %v376_v54 }
  0x4d   :  { %204 = vmax.xlane.f32.xlu2 %v203_v63  ;;  %118 = vadd.xlane.f32.xlu0 %v117_v0  ;;  %v753_v0 = vadd.s32 4294967272, %v692_v23 }
  0x4e   :  { %396 = vmatpush.msra.mxu0 %v375_v55 }
  0x50   :  { %397 = vmatpush.msra.mxu0 %v374_v59 }
  0x52   :  { %398 = vmatpush.msra.mxu0 %v373_v60 }
  0x53   :  { %209 = vmax.xlane.f32.xlu1 %v208_v10  ;;  %v761_v10 = vadd.s32 4294967256, %v692_v23 }
  0x54   :  { %399 = vmatpush.msra.mxu0 %v372_v61 }
  0x55   :  { %249 = vmax.xlane.f32.xlu2 %v248_v11  ;;  %244 = vmax.xlane.f32.xlu0 %v243_v12 }
  0x5b   :  { %254 = vmax.xlane.f32.xlu1 %v253_v6 }
  0x5d   :  { %214 = vmax.xlane.f32.xlu0 %v213_v7  ;;  %v767_v7 = vadd.s32 4294967248, %v692_v23 }
  0x7e   :  { %v124_v17 = vpop.xlane.xlu1 %123 }
  0x7f   :  { %v168_v24 = vmul.f32 0.003125, %v124_v17 }
  0x80   :  { %v94_v19 = vpop.xlane.xlu2 %93  ;;  %v84_v5 = vpop.xlane.xlu0 %83 }
  0x81   :  { %v160_v27 = vmul.f32 0.003125, %v84_v5  ;;  %v162_v31 = vmul.f32 0.003125, %v94_v19  ;;  %v303_v33 = vperm.slane %v168_v24, %v692_v23  ;;  %v772_v5 = vadd.s32 4294967240, %v692_v23 }
  0x83   :  { %v274_v21 = vperm.slane %v160_v27, %v692_v23  ;;  %v280_v41 = vperm.slane %v162_v31, %v698_v30 }
  0x86   :  { %v129_v26 = vpop.xlane.xlu1 %128 }
  0x87   :  { %v169_v28 = vmul.f32 0.003125, %v129_v26 }
  0x88   :  { %v134_v29 = vpop.xlane.xlu2 %133  ;;  %v89_v32 = vpop.xlane.xlu0 %88 }
  0x89   :  { %v304_v34 = vperm.slane %v169_v28, %v695_v25  ;;  %v161_v20 = vmul.f32 0.003125, %v89_v32  ;;  %v170_v62 = vmul.f32 0.003125, %v134_v29 }
  0x8b   :  { %v305_v22 = vsel %vm277_vm1, %v304_v34, %v303_v33  ;;  %v276_v37 = vperm.slane %v161_v20, %v695_v25  ;;  %v306_v12 = vperm.slane %v170_v62, %v698_v30 }
  0x8d   :  { %v278_v43 = vsel %vm277_vm1, %v276_v37, %v274_v21  ;;  %v307_v24 = vsel %vm281_vm2, %v306_v12, %v305_v22 }
  0x8e   :  { %v139_v44 = vpop.xlane.xlu1 %138  ;;  %v708_v45 = vsel %vm281_vm2, %v280_v41, %v278_v43 }
  0x8f   :  { %v171_v1 = vmul.f32 0.003125, %v139_v44 }
  0x90   :  { %v710_v35 = vpop.xlane.xlu2 %179  ;;  %v99_v36 = vpop.xlane.xlu0 %98 }
  0x91   :  { %v163_v9 = vmul.f32 0.003125, %v99_v36  ;;  %v308_v15 = vperm.slane %v171_v1, %v753_v0 }
  0x93   :  { %v284_v18 = vperm.slane %v163_v9, %v753_v0  ;;  %v309_v29 = vsel %vm285_vm3, %v308_v15, %v307_v24 }
  0x95   :  { %v286_v22 = vsel %vm285_vm3, %v284_v18, %v708_v45 }
  0x96   :  { %v712_v38 = vpop.xlane.xlu1 %219 }
  0x97   :  { %v352_v45 = vperm.slane %v712_v38, %v692_v23  ;;  %v337_v38 = vperm.slane %v710_v35, %v692_v23 }
  0x98   :  { %v714_v46 = vpop.xlane.xlu2 %224  ;;  %v716_v39 = vpop.xlane.xlu0 %184 }
  0x9e   :  { %v144_v40 = vpop.xlane.xlu1 %143 }
  0x9f   :  { %v172_v4 = vmul.f32 0.003125, %v144_v40 }
  0xa0   :  { %v718_v42 = vpop.xlane.xlu2 %189  ;;  %v104_v47 = vpop.xlane.xlu0 %103 }
  0xa1   :  { %v164_v13 = vmul.f32 0.003125, %v104_v47  ;;  %v310_v6 = vperm.slane %v172_v4, %v758_v3  ;;  %v340_v1 = vperm.slane %v718_v42, %v698_v30 }
  0xa3   :  { %v288_v26 = vperm.slane %v164_v13, %v758_v3  ;;  %v311_v34 = vsel %vm289_vm4, %v310_v6, %v309_v29 }
  0xa5   :  { %v290_v44 = vsel %vm289_vm4, %v288_v26, %v286_v22 }
  0xa6   :  { %v109_v49 = vpop.xlane.xlu1 %108 }
  0xa7   :  { %v165_v16 = vmul.f32 0.003125, %v109_v49 }
  0xa8   :  { %v149_v50 = vpop.xlane.xlu2 %148  ;;  %v723_v51 = vpop.xlane.xlu0 %229 }
  0xa9   :  { %v173_v11 = vmul.f32 0.003125, %v149_v50  ;;  %v292_v31 = vperm.slane %v165_v16, %v761_v10  ;;  %v353_v50 = vperm.slane %v714_v46, %v695_v25  ;;  %v355_v53 = vperm.slane %v723_v51, %v698_v30 }
  0xaa   :  { %v338_v46 = vperm.slane %v716_v39, %v695_v25 }
  0xab   :  { %v312_v19 = vperm.slane %v173_v11, %v761_v10  ;;  %v294_v40 = vsel %vm293_vm5, %v292_v31, %v290_v44  ;;  %v354_v61 = vsel %vm277_vm1, %v353_v50, %v352_v45 }
  0xac   :  { %v339_v39 = vsel %vm277_vm1, %v338_v46, %v337_v38 }
  0xad   :  { %v313_v37 = vsel %vm293_vm5, %v312_v19, %v311_v34  ;;  %v341_v42 = vsel %vm281_vm2, %v340_v1, %v339_v39 }
  0xae   :  { %v737_v56 = vpop.xlane.xlu1 %234 }
  0xb0   :  { %v114_v57 = vpop.xlane.xlu2 %113  ;;  %v739_v58 = vpop.xlane.xlu0 %194 }
  0xb1   :  { %v166_v17 = vmul.f32 0.003125, %v114_v57  ;;  %v357_v57 = vperm.slane %v737_v56, %v753_v0  ;;  %v356_v56 = vsel %vm281_vm2, %v355_v53, %v354_v61 }
  0xb3   :  { %v296_v20 = vperm.slane %v166_v17, %v767_v7  ;;  %v358_v4 = vsel %vm285_vm3, %v357_v57, %v356_v56  ;;  %v380_v17 = vld [vmem:[%s841_s2] sm:$0xf]  ;;  %s550_s2 = smov [#allocation5]  }
  0xb4   :  { %482 = vmatpush.msk.msra.mxu1 %vm409_vm11, %v380_v17  ;;  %s466_s8 = sshll.u32 %s550_s2, 4  ;;  %s467_s8 = int_to_ptr.vmem [resolvable:$true] %s466_s8 }
  0xb5   :  { %v298_v49 = vsel %vm297_vm6, %v296_v20, %v294_v40 }
  0xb6   :  { %v750_v63 = vpop.xlane.xlu1 %199 }
  0xb7   :  { %v344_v23 = vperm.slane %v750_v63, %v758_v3 }
  0xb8   :  { %v755_v2 = vpop.xlane.xlu2 %239  ;;  %v154_v8 = vpop.xlane.xlu0 %153 }
  0xb9   :  { %v174_v14 = vmul.f32 0.003125, %v154_v8  ;;  %v359_v59 = vperm.slane %v755_v2, %v758_v3  ;;  %v342_v2 = vperm.slane %v739_v58, %v753_v0 }
  0xbb   :  { %v314_v27 = vperm.slane %v174_v14, %v767_v7  ;;  %v360_v35 = vsel %vm289_vm4, %v359_v59, %v358_v4  ;;  %v343_v58 = vsel %vm285_vm3, %v342_v2, %v341_v42 }
  0xbc   :  { %v345_v63 = vsel %vm289_vm4, %v344_v23, %v343_v58 }
  0xbd   :  { %v315_v36 = vsel %vm297_vm6, %v314_v27, %v313_v37 }
  0xbe   :  { %v159_v28 = vpop.xlane.xlu1 %158 }
  0xbf   :  { %v175_v32 = vmul.f32 0.003125, %v159_v28 }
  0xc0   :  { %v205_v33 = vpop.xlane.xlu2 %204  ;;  %v119_v21 = vpop.xlane.xlu0 %118 }
  0xc1   :  { %v316_v41 = vperm.slane %v175_v32, %v772_v5  ;;  %v167_v43 = vmul.f32 0.003125, %v119_v21  ;;  %v346_v8 = vperm.slane %v205_v33, %v761_v10 }
  0xc3   :  { %v300_v47 = vperm.slane %v167_v43, %v772_v5  ;;  %v317_v48 = vsel %vm301_vm7, %v316_v41, %v315_v36  ;;  %v347_v13 = vsel %vm293_vm5, %v346_v8, %v345_v63 }
  0xc5   :  { %v302_v52 = vsel %vm301_vm7, %v300_v47, %v298_v49 }
  0xc6   :  { %v210_v54 = vpop.xlane.xlu1 %209  ;;  %v319_v55 = vsel %vm318_vm8, %v317_v48, %v302_v52 }
  0xc7   :  { %v348_v9 = vperm.slane %v210_v54, %v767_v7 }
  0xc8   :  { %v245_v60 = vpop.xlane.xlu0 %244  ;;  %v250_v51 = vpop.xlane.xlu2 %249 }
  0xc9   :  { %v361_v62 = vperm.slane %v245_v60, %v761_v10  ;;  %v363_v25 = vperm.slane %v250_v51, %v767_v7  ;;  %v349_v15 = vsel %vm297_vm6, %v348_v9, %v347_v13 }
  0xcb   :  { %v362_v30 = vsel %vm293_vm5, %v361_v62, %v360_v35 }
  0xcc   :  { %v364_v3 = vsel %vm297_vm6, %v363_v25, %v362_v30 }
  0xce   :  { %v255_v11 = vpop.xlane.xlu1 %254 }
  0xcf   :  { %v365_v0 = vperm.slane %v255_v11, %v772_v5 }
  0xd0   :  { %v215_v12 = vpop.xlane.xlu0 %214 }
  0xd1   :  { %v366_v10 = vsel %vm301_vm7, %v365_v0, %v364_v3  ;;  %v350_v14 = vperm.slane %v215_v12, %v772_v5 }
  0xd3   :  { %v351_v16 = vsel %vm301_vm7, %v350_v14, %v349_v15 }
  0xd4   :  { %v368_v6 = vsel %vm367_vm9, %v366_v10, %v351_v16 }
  0xd5   :  { %v371_v7 = vsel %vm370_vm10, %v319_v55, %v368_v6 }
  0xd6   :  { %481 = vmatmul.msk.f32.vlgmr.msra.gmra.mxu0 %vm80_vm0, %v371_v7  ;;  %vm459_vm0 = vcmask 516096  }
 0x153   :  { %v401_v18 = vpop.f32.mrf.mxu0 }
 0x154   :  { %v404_v19 = vmax.f32 %v401_v18, 0.0 }
 0x156   :  { %483 = vmatmul.msk.f32.vlgmr.msra.gmra.mxu1 %vm405_vm12, %v404_v19 }
 0x1d3   :  { %v430_v5 = vpop.f32.mrf.mxu1 }
 0x1d4   :  { %v434_v24 = vrot.slane %v430_v5, 2 }
 0x1d6   :  { %v436_v26 = vadd.f32 %v434_v24, %v430_v5 }
 0x1d8   :  { %v484_v27 = vmul.f32 -1.442695, %v436_v26 }
 0x1da   :  { %491 = vpow2.f32 %v484_v27 }
 0x1e0   :  { %v492_v28 = vpop.eup %491 }
 0x1e1   :  { %v440_v29 = vadd.f32 1.0, %v492_v28 }
 0x1e3   :  { %493 = vrcp.f32 %v440_v29  ;;  %v452_v34 = vand.u32 2147483648, %v440_v29  ;;  %v450_v21 = vand.u32 2147483647, %v440_v29  ;;  %vm446_vm14 = vweird.f32 %v440_v29 }
 0x1e5   :  { %v453_v37 = vor.u32 1.1754944e-38, %v452_v34  ;;  %vm451_vm1 = vcmp.eq.f32.partialorder %v450_v21, 8.507059e+37 }
 0x1e9   :  { %v494_v31 = vpop.eup %493 }
 0x1ea   :  { %v442_v32 = vmul.f32 %v494_v31, %v440_v29  ;;  %vm447_vm13 = vweird.f32 %v494_v31 }
 0x1eb   :  { %vm448_vm15 = vmor %vm446_vm14, %vm447_vm13 }
 0x1ec   :  { %v443_v33 = vsub.f32 1.0, %v442_v32 }
 0x1ee   :  { %v444_v20 = vmul.f32 %v494_v31, %v443_v33 }
 0x1f0   :  { %v445_v22 = vadd.f32 %v494_v31, %v444_v20 }
 0x1f2   :  { %v449_v41 = vsel %vm448_vm15, %v494_v31, %v445_v22 }
 0x1f3   :  { %v454_v43 = vsel %vm451_vm1, %v453_v37, %v449_v41 }
 0x1f4   :  { %v457_v44 = vrot.slane %v454_v43, 1  ;;  %460 = vst.msk [vmem:[#allocation5] sm:$0x1] %vm459_vm0, %v454_v43 }
 0x1f6   :  { %461 = vst.msk [vmem:[#allocation5 + $0x1] sm:$0x1] %vm459_vm0, %v457_v44 }
 0x1f7   :  { %474 = dma.vmem_to_hbm [thread:$0]  %s467_s8, 32, %s469_s11, [#allocation4], %s551_s12, %s551_s12, %s552_s13  }
 0x1f8   :  { %545 = dma.done.wait [#allocation4], 32  }
 0x1f9   :  { %546 = vsyncadd [#allocation4], 4294967264 }
 0x1fa   :  { %479 = vsyncpa [#allocation3], 1 }
 0x1fb   :  { %480 = vsyncpa [#allocation4], 1 }

</bundles_post_ra>
